<compile_context>
chip_gen: v6e
topology: v6e:2x2x1
jax: 0.10.0
libtpu: 0.0.40
codegen_flags: <defaults>
</compile_context>

<pallas_src>
import functools

import jax
import jax.numpy as jnp
from jax.experimental import pallas as pl
from jax.experimental.pallas import tpu as pltpu

BN_EPS = 1e-5
LANE = 128
SUBLANE = 8
MAX_TILE_N = 8192          # rows per grid step (>=512 reaches ~85% of HBM roofline)
VMEM_LIMIT = 32 * 1024 * 1024


def _round_up(x, m):
    return (x + m - 1) // m * m


def _stats_kernel(x_ref, *refs, num_layers, n_rows, tile_n):
    """Run `num_layers` fused (Linear -> ReLU) layers on this batch tile and
    accumulate per-feature sum and sum-of-squares (masked to the true batch size)
    into two resident (1, H) output accumulators."""
    wb = refs[:2 * num_layers]
    sum_ref = refs[2 * num_layers]
    sq_ref = refs[2 * num_layers + 1]
    i = pl.program_id(0)

    @pl.when(i == 0)
    def _():
        sum_ref[...] = jnp.zeros_like(sum_ref)
        sq_ref[...] = jnp.zeros_like(sq_ref)

    h = x_ref[...].astype(jnp.float32)
    for l in range(num_layers):
        w = wb[2 * l][...]
        b = wb[2 * l + 1][...]
        h = jnp.maximum(jnp.dot(h, w, preferred_element_type=jnp.float32) + b, 0.0)

    # Mask zero-padded batch rows: ReLU(0 @ W + b) = ReLU(b) != 0 would bias the stats.
    row = jax.lax.broadcasted_iota(jnp.int32, (tile_n, 1), 0) + i * tile_n
    hm = jnp.where(row < n_rows, h, 0.0)
    sum_ref[...] += jnp.sum(hm, axis=0, keepdims=True)
    sq_ref[...] += jnp.sum(hm * hm, axis=0, keepdims=True)


def _fwd_kernel(x_ref, w1_ref, b1_ref, w2_ref, b2_ref, w3_ref, b3_ref, o_ref):
    """Full forward for one batch tile.  BN1/BN2 are pre-folded into W2/b2 and W3/b3;
    W3/b3 are lane-padded so the output store is lane-dense."""
    h = x_ref[...].astype(jnp.float32)
    h = jnp.maximum(
        jnp.dot(h, w1_ref[...], preferred_element_type=jnp.float32) + b1_ref[...], 0.0)
    h = jnp.maximum(
        jnp.dot(h, w2_ref[...], preferred_element_type=jnp.float32) + b2_ref[...], 0.0)
    logits = jnp.dot(h, w3_ref[...], preferred_element_type=jnp.float32) + b3_ref[...]
    # Exact sigmoid (EUP exp + exact reciprocal) to stay within 1e-5 of the reference.
    o_ref[...] = 1.0 / (1.0 + jnp.exp(-logits))


@functools.partial(jax.jit, static_argnames=("input_dim", "output_dim"))
def mydnn_forward(x, params, *, input_dim, output_dim):
    (w1, b1, g1, be1, w2, b2, g2, be2, w3, b3) = params
    hidden = w1.shape[1]

    # Glue: x.view(-1, input_dim).float()
    x2d = jnp.reshape(x, (-1, input_dim)).astype(jnp.float32)
    n = x2d.shape[0]

    tile_n = min(MAX_TILE_N, _round_up(n, SUBLANE))
    n_pad = _round_up(n, tile_n)
    grid_t = n_pad // tile_n
    x_pad = jnp.pad(x2d, ((0, n_pad - n), (0, 0)))

    # Lane-dense last Linear (pad output features to a multiple of 128 lanes).
    out_pad_dim = _round_up(output_dim, LANE)
    w3p = jnp.pad(w3, ((0, 0), (0, out_pad_dim - output_dim)))
    b3p = jnp.pad(b3, ((0, 0), (0, out_pad_dim - output_dim)))

    x_spec = pl.BlockSpec((tile_n, input_dim), lambda i: (i, 0))

    def const_spec(shape):
        # Same block every grid step -> DMA'd once, stays resident in VMEM.
        return pl.BlockSpec(shape, lambda i: (0, 0))

    stat_spec = pl.BlockSpec((1, hidden), lambda i: (0, 0))
    stat_shape = jax.ShapeDtypeStruct((1, hidden), jnp.float32)

    cp_acc = pltpu.CompilerParams(dimension_semantics=("arbitrary",),
                                  vmem_limit_bytes=VMEM_LIMIT)
    cp_par = pltpu.CompilerParams(dimension_semantics=("parallel",),
                                  vmem_limit_bytes=VMEM_LIMIT)

    # ---- pass 1: global-batch stats of h1 = ReLU(x @ W1 + b1) ----
    sum1, sq1 = pl.pallas_call(
        functools.partial(_stats_kernel, num_layers=1, n_rows=n, tile_n=tile_n),
        grid=(grid_t,),
        in_specs=[x_spec, const_spec((input_dim, hidden)), const_spec((1, hidden))],
        out_specs=(stat_spec, stat_spec),
        out_shape=(stat_shape, stat_shape),
        compiler_params=cp_acc,
        cost_estimate=pl.CostEstimate(
            flops=2 * n_pad * input_dim * hidden,
            transcendentals=0,
            bytes_accessed=n_pad * input_dim * 4 + (input_dim + 3) * hidden * 4),
    )(x_pad, w1, b1)

    mean1 = sum1 / n
    var1 = jnp.maximum(sq1 / n - mean1 * mean1, 0.0)          # biased batch variance
    scale1 = g1 * jax.lax.rsqrt(var1 + BN_EPS)
    shift1 = be1 - mean1 * scale1
    # Fold BN1 into Linear2: (h*s1 + t1) @ W2 + b2 = h @ (s1^T * W2) + (t1 @ W2 + b2)
    w2f = w2 * scale1.T
    b2f = b2 + shift1 @ w2

    # ---- pass 2: global-batch stats of h2 = ReLU(BN1(h1) @ W2 + b2) ----
    sum2, sq2 = pl.pallas_call(
        functools.partial(_stats_kernel, num_layers=2, n_rows=n, tile_n=tile_n),
        grid=(grid_t,),
        in_specs=[x_spec,
                  const_spec((input_dim, hidden)), const_spec((1, hidden)),
                  const_spec((hidden, hidden)), const_spec((1, hidden))],
        out_specs=(stat_spec, stat_spec),
        out_shape=(stat_shape, stat_shape),
        compiler_params=cp_acc,
        cost_estimate=pl.CostEstimate(
            flops=2 * n_pad * hidden * (input_dim + hidden),
            transcendentals=0,
            bytes_accessed=n_pad * input_dim * 4 + (input_dim + hidden + 5) * hidden * 4),
    )(x_pad, w1, b1, w2f, b2f)

    mean2 = sum2 / n
    var2 = jnp.maximum(sq2 / n - mean2 * mean2, 0.0)
    scale2 = g2 * jax.lax.rsqrt(var2 + BN_EPS)
    shift2 = be2 - mean2 * scale2
    # Fold BN2 into the (lane-padded) Linear3.
    w3f = w3p * scale2.T
    b3f = b3p + shift2 @ w3p

    # ---- pass 3: per-tile forward + sigmoid, lane-dense output ----
    out_padded = pl.pallas_call(
        _fwd_kernel,
        grid=(grid_t,),
        in_specs=[x_spec,
                  const_spec((input_dim, hidden)), const_spec((1, hidden)),
                  const_spec((hidden, hidden)), const_spec((1, hidden)),
                  const_spec((hidden, out_pad_dim)), const_spec((1, out_pad_dim))],
        out_specs=pl.BlockSpec((tile_n, out_pad_dim), lambda i: (i, 0)),
        out_shape=jax.ShapeDtypeStruct((n_pad, out_pad_dim), jnp.float32),
        compiler_params=cp_par,
        cost_estimate=pl.CostEstimate(
            flops=2 * n_pad * hidden * (input_dim + hidden + out_pad_dim),
            transcendentals=n_pad * out_pad_dim,
            bytes_accessed=n_pad * (input_dim + out_pad_dim) * 4),
    )(x_pad, w1, b1, w2f, b2f, w3f, b3f)

    return out_padded[:n, :output_dim]


def init_params(key, input_dim, hidden_dim, output_dim):
    """Deterministic synthetic params. Linear weights stored as (in, out)."""
    ks = jax.random.split(key, 6)

    def linear(kw, kb, fan_in, fan_out):
        bound = 1.0 / jnp.sqrt(jnp.float32(fan_in))
        w = jax.random.uniform(kw, (fan_in, fan_out), jnp.float32, -bound, bound)
        b = jax.random.uniform(kb, (1, fan_out), jnp.float32, -bound, bound)
        return w, b

    w1, b1 = linear(ks[0], ks[1], input_dim, hidden_dim)
    w2, b2 = linear(ks[2], ks[3], hidden_dim, hidden_dim)
    w3, b3 = linear(ks[4], ks[5], hidden_dim, output_dim)

    # BatchNorm1d affine params (PyTorch init: gamma=1, beta=0), kept 2D.
    g1 = jnp.ones((1, hidden_dim), jnp.float32)
    be1 = jnp.zeros((1, hidden_dim), jnp.float32)
    g2 = jnp.ones((1, hidden_dim), jnp.float32)
    be2 = jnp.zeros((1, hidden_dim), jnp.float32)

    return (w1, b1, g1, be1, w2, b2, g2, be2, w3, b3)


def reference_forward(x, params, input_dim):
    """Pure-JAX reference (PyTorch training-mode BN semantics)."""
    (w1, b1, g1, be1, w2, b2, g2, be2, w3, b3) = params
    h = jnp.reshape(x, (-1, input_dim)).astype(jnp.float32)

    def bn(h, g, be):
        m = jnp.mean(h, axis=0, keepdims=True)
        v = jnp.mean((h - m) ** 2, axis=0, keepdims=True)
        return (h - m) / jnp.sqrt(v + BN_EPS) * g + be

    h = jnp.maximum(h @ w1 + b1, 0.0)
    h = bn(h, g1, be1)
    h = jnp.maximum(h @ w2 + b2, 0.0)
    h = bn(h, g2, be2)
    return jax.nn.sigmoid(h @ w3 + b3)


if __name__ == "__main__":
    input_dim, hidden_dim, output_dim = 16, 32, 4   # hidden must be 32 (BatchNorm1d(32))
    assert hidden_dim == 32

    key = jax.random.PRNGKey(0)
    kx, kp = jax.random.split(key)

    # Arbitrary leading shape that forward() flattens: (2, 4, 16) -> (8, 16)
    x = jax.random.normal(kx, (2, 4, input_dim), dtype=jnp.float32)
    params = init_params(kp, input_dim, hidden_dim, output_dim)

    out = mydnn_forward(x, params, input_dim=input_dim, output_dim=output_dim)
    out = jax.block_until_ready(out)

    ref = reference_forward(x, params, input_dim)
    assert out.shape == (8, output_dim), out.shape
    assert jnp.allclose(out, ref, atol=2e-5, rtol=2e-5), "mismatch vs reference"

    print("KERNEL_OK")
</pallas_src>

<mosaic_0001>
module attributes {stable_mosaic.version = 11 : i64} {
  func.func @_stats_kernel(%arg0: i32, %arg1: memref<8x16xf32, #tpu.memory_space<vmem>>, %arg2: memref<16x32xf32, #tpu.memory_space<vmem>>, %arg3: memref<1x32xf32, #tpu.memory_space<vmem>>, %arg4: memref<1x32xf32, #tpu.memory_space<vmem>>, %arg5: memref<1x32xf32, #tpu.memory_space<vmem>>) attributes {dimension_semantics = [#tpu.dimension_semantics<arbitrary>], iteration_bounds = array<i64: 1>, scalar_prefetch = 0 : i64, scratch_operands = 0 : i64, tpu.core_type = #tpu.core_type<tc>, window_params = [{transform_indices = @transform_0, window_bounds = array<i64: 8, 16>}, {pipeline_mode = #tpu.pipeline_mode<synchronous>, transform_indices = @transform_1, window_bounds = array<i64: 16, 32>}, {pipeline_mode = #tpu.pipeline_mode<synchronous>, transform_indices = @transform_2, window_bounds = array<i64: 1, 32>}, {pipeline_mode = #tpu.pipeline_mode<synchronous>, transform_indices = @transform_3, window_bounds = array<i64: 1, 32>}, {pipeline_mode = #tpu.pipeline_mode<synchronous>, transform_indices = @transform_4, window_bounds = array<i64: 1, 32>}]} {
    %c0_i32 = arith.constant 0 : i32
    %0 = arith.cmpi eq, %arg0, %c0_i32 : i32
    %1 = arith.extui %0 : i1 to i32
    %c0_i32_0 = arith.constant 0 : i32
    %2 = arith.cmpi ne, %1, %c0_i32_0 : i32
    scf.if %2 {
      %cst_19 = arith.constant 0.000000e+00 : f32
      %32 = vector.broadcast %cst_19 : f32 to vector<1x32xf32>
      %c0_20 = arith.constant 0 : index
      %c0_21 = arith.constant 0 : index
      %33 = vector.load %arg4[%c0_20, %c0_21] : memref<1x32xf32, #tpu.memory_space<vmem>>, vector<1x32xf32>
      tpu.vector_store %arg4[%c0_20, %c0_21], %32 {strides = array<i32>} : memref<1x32xf32, #tpu.memory_space<vmem>>, vector<1x32xf32>,
      %cst_22 = arith.constant 0.000000e+00 : f32
      %34 = vector.broadcast %cst_22 : f32 to vector<1x32xf32>
      %c0_23 = arith.constant 0 : index
      %c0_24 = arith.constant 0 : index
      %35 = vector.load %arg5[%c0_23, %c0_24] : memref<1x32xf32, #tpu.memory_space<vmem>>, vector<1x32xf32>
      tpu.vector_store %arg5[%c0_23, %c0_24], %34 {strides = array<i32>} : memref<1x32xf32, #tpu.memory_space<vmem>>, vector<1x32xf32>,
    } else {
    }
    %c0 = arith.constant 0 : index
    %c0_1 = arith.constant 0 : index
    %3 = vector.load %arg1[%c0, %c0_1] : memref<8x16xf32, #tpu.memory_space<vmem>>, vector<8x16xf32>
    %c0_2 = arith.constant 0 : index
    %c0_3 = arith.constant 0 : index
    %4 = vector.load %arg2[%c0_2, %c0_3] : memref<16x32xf32, #tpu.memory_space<vmem>>, vector<16x32xf32>
    %c0_4 = arith.constant 0 : index
    %c0_5 = arith.constant 0 : index
    %5 = vector.load %arg3[%c0_4, %c0_5] : memref<1x32xf32, #tpu.memory_space<vmem>>, vector<1x32xf32>
    %cst = arith.constant dense<0.000000e+00> : vector<8x32xf32>
    %6 = tpu.matmul %3, %4, %cst {dimension_numbers = #tpu.dot_dimension_numbers<[1], [0], [0], [1], [0, 0, 1, 1], [], []>} : vector<8x16xf32>, vector<16x32xf32>, vector<8x32xf32> -> vector<8x32xf32>
    %7 = vector.broadcast %5 : vector<1x32xf32> to vector<8x32xf32>
    %8 = arith.addf %6, %7 : vector<8x32xf32>
    %cst_6 = arith.constant 0.000000e+00 : f32
    %9 = vector.broadcast %cst_6 : f32 to vector<8x32xf32>
    %10 = arith.maximumf %8, %9 : vector<8x32xf32>
    %11 = tpu.iota {dimensions = array<i32: 0>} : vector<8x1xi32>
    %c8_i32 = arith.constant 8 : i32
    %12 = arith.muli %arg0, %c8_i32 : i32
    %13 = vector.broadcast %12 : i32 to vector<8x1xi32>
    %14 = arith.addi %11, %13 : vector<8x1xi32>
    %c8_i32_7 = arith.constant 8 : i32
    %15 = vector.broadcast %c8_i32_7 : i32 to vector<8x1xi32>
    %16 = arith.cmpi slt, %14, %15 : vector<8x1xi32>
    %cst_8 = arith.constant 0.000000e+00 : f32
    %17 = vector.shape_cast %16 : vector<8x1xi1> to vector<8x1xi1>
    %18 = vector.broadcast %17 : vector<8x1xi1> to vector<8x32xi1>
    %19 = vector.broadcast %cst_8 : f32 to vector<8x32xf32>
    %20 = arith.select %18, %10, %19 : vector<8x32xi1>, vector<8x32xf32>
    %c0_9 = arith.constant 0 : index
    %c0_10 = arith.constant 0 : index
    %21 = vector.load %arg4[%c0_9, %c0_10] : memref<1x32xf32, #tpu.memory_space<vmem>>, vector<1x32xf32>
    %cst_11 = arith.constant dense<0.000000e+00> : vector<32xf32>
    %22 = vector.multi_reduction <add>, %20, %cst_11 [0] : vector<8x32xf32> to vector<32xf32>
    %23 = vector.shape_cast %22 : vector<32xf32> to vector<1x32xf32>
    %24 = arith.addf %21, %23 : vector<1x32xf32>
    %c0_12 = arith.constant 0 : index
    %c0_13 = arith.constant 0 : index
    %25 = vector.load %arg4[%c0_12, %c0_13] : memref<1x32xf32, #tpu.memory_space<vmem>>, vector<1x32xf32>
    tpu.vector_store %arg4[%c0_12, %c0_13], %24 {strides = array<i32>} : memref<1x32xf32, #tpu.memory_space<vmem>>, vector<1x32xf32>,
    %c0_14 = arith.constant 0 : index
    %c0_15 = arith.constant 0 : index
    %26 = vector.load %arg5[%c0_14, %c0_15] : memref<1x32xf32, #tpu.memory_space<vmem>>, vector<1x32xf32>
    %27 = arith.mulf %20, %20 : vector<8x32xf32>
    %cst_16 = arith.constant dense<0.000000e+00> : vector<32xf32>
    %28 = vector.multi_reduction <add>, %27, %cst_16 [0] : vector<8x32xf32> to vector<32xf32>
    %29 = vector.shape_cast %28 : vector<32xf32> to vector<1x32xf32>
    %30 = arith.addf %26, %29 : vector<1x32xf32>
    %c0_17 = arith.constant 0 : index
    %c0_18 = arith.constant 0 : index
    %31 = vector.load %arg5[%c0_17, %c0_18] : memref<1x32xf32, #tpu.memory_space<vmem>>, vector<1x32xf32>
    tpu.vector_store %arg5[%c0_17, %c0_18], %30 {strides = array<i32>} : memref<1x32xf32, #tpu.memory_space<vmem>>, vector<1x32xf32>,
    return
  }
  func.func @transform_0(%arg0: i32) -> (i32, i32) {
    %c0_i32 = arith.constant 0 : i32
    %c0_i32_0 = arith.constant 0 : i32
    return %arg0, %c0_i32 : i32, i32
  }
  func.func @transform_1(%arg0: i32) -> (i32, i32) {
    %c0_i32 = arith.constant 0 : i32
    %c0_i32_0 = arith.constant 0 : i32
    %c0_i32_1 = arith.constant 0 : i32
    return %c0_i32, %c0_i32_0 : i32, i32
  }
  func.func @transform_2(%arg0: i32) -> (i32, i32) {
    %c0_i32 = arith.constant 0 : i32
    %c0_i32_0 = arith.constant 0 : i32
    %c0_i32_1 = arith.constant 0 : i32
    return %c0_i32, %c0_i32_0 : i32, i32
  }
  func.func @transform_3(%arg0: i32) -> (i32, i32) {
    %c0_i32 = arith.constant 0 : i32
    %c0_i32_0 = arith.constant 0 : i32
    %c0_i32_1 = arith.constant 0 : i32
    return %c0_i32, %c0_i32_0 : i32, i32
  }
  func.func @transform_4(%arg0: i32) -> (i32, i32) {
    %c0_i32 = arith.constant 0 : i32
    %c0_i32_0 = arith.constant 0 : i32
    %c0_i32_1 = arith.constant 0 : i32
    return %c0_i32, %c0_i32_0 : i32, i32
  }
}

module attributes {stable_mosaic.version = 11 : i64} {
  func.func @_stats_kernel(%arg0: i32, %arg1: memref<8x16xf32, #tpu.memory_space<vmem>>, %arg2: memref<16x32xf32, #tpu.memory_space<vmem>>, %arg3: memref<1x32xf32, #tpu.memory_space<vmem>>, %arg4: memref<32x32xf32, #tpu.memory_space<vmem>>, %arg5: memref<1x32xf32, #tpu.memory_space<vmem>>, %arg6: memref<1x32xf32, #tpu.memory_space<vmem>>, %arg7: memref<1x32xf32, #tpu.memory_space<vmem>>) attributes {dimension_semantics = [#tpu.dimension_semantics<arbitrary>], iteration_bounds = array<i64: 1>, scalar_prefetch = 0 : i64, scratch_operands = 0 : i64, tpu.core_type = #tpu.core_type<tc>, window_params = [{transform_indices = @transform_0, window_bounds = array<i64: 8, 16>}, {pipeline_mode = #tpu.pipeline_mode<synchronous>, transform_indices = @transform_1, window_bounds = array<i64: 16, 32>}, {pipeline_mode = #tpu.pipeline_mode<synchronous>, transform_indices = @transform_2, window_bounds = array<i64: 1, 32>}, {pipeline_mode = #tpu.pipeline_mode<synchronous>, transform_indices = @transform_3, window_bounds = array<i64: 32, 32>}, {pipeline_mode = #tpu.pipeline_mode<synchronous>, transform_indices = @transform_4, window_bounds = array<i64: 1, 32>}, {pipeline_mode = #tpu.pipeline_mode<synchronous>, transform_indices = @transform_5, window_bounds = array<i64: 1, 32>}, {pipeline_mode = #tpu.pipeline_mode<synchronous>, transform_indices = @transform_6, window_bounds = array<i64: 1, 32>}]} {
    %c0_i32 = arith.constant 0 : i32
    %0 = arith.cmpi eq, %arg0, %c0_i32 : i32
    %1 = arith.extui %0 : i1 to i32
    %c0_i32_0 = arith.constant 0 : i32
    %2 = arith.cmpi ne, %1, %c0_i32_0 : i32
    scf.if %2 {
      %cst_25 = arith.constant 0.000000e+00 : f32
      %39 = vector.broadcast %cst_25 : f32 to vector<1x32xf32>
      %c0_26 = arith.constant 0 : index
      %c0_27 = arith.constant 0 : index
      %40 = vector.load %arg6[%c0_26, %c0_27] : memref<1x32xf32, #tpu.memory_space<vmem>>, vector<1x32xf32>
      tpu.vector_store %arg6[%c0_26, %c0_27], %39 {strides = array<i32>} : memref<1x32xf32, #tpu.memory_space<vmem>>, vector<1x32xf32>,
      %cst_28 = arith.constant 0.000000e+00 : f32
      %41 = vector.broadcast %cst_28 : f32 to vector<1x32xf32>
      %c0_29 = arith.constant 0 : index
      %c0_30 = arith.constant 0 : index
      %42 = vector.load %arg7[%c0_29, %c0_30] : memref<1x32xf32, #tpu.memory_space<vmem>>, vector<1x32xf32>
      tpu.vector_store %arg7[%c0_29, %c0_30], %41 {strides = array<i32>} : memref<1x32xf32, #tpu.memory_space<vmem>>, vector<1x32xf32>,
    } else {
    }
    %c0 = arith.constant 0 : index
    %c0_1 = arith.constant 0 : index
    %3 = vector.load %arg1[%c0, %c0_1] : memref<8x16xf32, #tpu.memory_space<vmem>>, vector<8x16xf32>
    %c0_2 = arith.constant 0 : index
    %c0_3 = arith.constant 0 : index
    %4 = vector.load %arg2[%c0_2, %c0_3] : memref<16x32xf32, #tpu.memory_space<vmem>>, vector<16x32xf32>
    %c0_4 = arith.constant 0 : index
    %c0_5 = arith.constant 0 : index
    %5 = vector.load %arg3[%c0_4, %c0_5] : memref<1x32xf32, #tpu.memory_space<vmem>>, vector<1x32xf32>
    %cst = arith.constant dense<0.000000e+00> : vector<8x32xf32>
    %6 = tpu.matmul %3, %4, %cst {dimension_numbers = #tpu.dot_dimension_numbers<[1], [0], [0], [1], [0, 0, 1, 1], [], []>} : vector<8x16xf32>, vector<16x32xf32>, vector<8x32xf32> -> vector<8x32xf32>
    %7 = vector.broadcast %5 : vector<1x32xf32> to vector<8x32xf32>
    %8 = arith.addf %6, %7 : vector<8x32xf32>
    %cst_6 = arith.constant 0.000000e+00 : f32
    %9 = vector.broadcast %cst_6 : f32 to vector<8x32xf32>
    %10 = arith.maximumf %8, %9 : vector<8x32xf32>
    %c0_7 = arith.constant 0 : index
    %c0_8 = arith.constant 0 : index
    %11 = vector.load %arg4[%c0_7, %c0_8] : memref<32x32xf32, #tpu.memory_space<vmem>>, vector<32x32xf32>
    %c0_9 = arith.constant 0 : index
    %c0_10 = arith.constant 0 : index
    %12 = vector.load %arg5[%c0_9, %c0_10] : memref<1x32xf32, #tpu.memory_space<vmem>>, vector<1x32xf32>
    %cst_11 = arith.constant dense<0.000000e+00> : vector<8x32xf32>
    %13 = tpu.matmul %10, %11, %cst_11 {dimension_numbers = #tpu.dot_dimension_numbers<[1], [0], [0], [1], [0, 0, 1, 1], [], []>} : vector<8x32xf32>, vector<32x32xf32>, vector<8x32xf32> -> vector<8x32xf32>
    %14 = vector.broadcast %12 : vector<1x32xf32> to vector<8x32xf32>
    %15 = arith.addf %13, %14 : vector<8x32xf32>
    %cst_12 = arith.constant 0.000000e+00 : f32
    %16 = vector.broadcast %cst_12 : f32 to vector<8x32xf32>
    %17 = arith.maximumf %15, %16 : vector<8x32xf32>
    %18 = tpu.iota {dimensions = array<i32: 0>} : vector<8x1xi32>
    %c8_i32 = arith.constant 8 : i32
    %19 = arith.muli %arg0, %c8_i32 : i32
    %20 = vector.broadcast %19 : i32 to vector<8x1xi32>
    %21 = arith.addi %18, %20 : vector<8x1xi32>
    %c8_i32_13 = arith.constant 8 : i32
    %22 = vector.broadcast %c8_i32_13 : i32 to vector<8x1xi32>
    %23 = arith.cmpi slt, %21, %22 : vector<8x1xi32>
    %cst_14 = arith.constant 0.000000e+00 : f32
    %24 = vector.shape_cast %23 : vector<8x1xi1> to vector<8x1xi1>
    %25 = vector.broadcast %24 : vector<8x1xi1> to vector<8x32xi1>
    %26 = vector.broadcast %cst_14 : f32 to vector<8x32xf32>
    %27 = arith.select %25, %17, %26 : vector<8x32xi1>, vector<8x32xf32>
    %c0_15 = arith.constant 0 : index
    %c0_16 = arith.constant 0 : index
    %28 = vector.load %arg6[%c0_15, %c0_16] : memref<1x32xf32, #tpu.memory_space<vmem>>, vector<1x32xf32>
    %cst_17 = arith.constant dense<0.000000e+00> : vector<32xf32>
    %29 = vector.multi_reduction <add>, %27, %cst_17 [0] : vector<8x32xf32> to vector<32xf32>
    %30 = vector.shape_cast %29 : vector<32xf32> to vector<1x32xf32>
    %31 = arith.addf %28, %30 : vector<1x32xf32>
    %c0_18 = arith.constant 0 : index
    %c0_19 = arith.constant 0 : index
    %32 = vector.load %arg6[%c0_18, %c0_19] : memref<1x32xf32, #tpu.memory_space<vmem>>, vector<1x32xf32>
    tpu.vector_store %arg6[%c0_18, %c0_19], %31 {strides = array<i32>} : memref<1x32xf32, #tpu.memory_space<vmem>>, vector<1x32xf32>,
    %c0_20 = arith.constant 0 : index
    %c0_21 = arith.constant 0 : index
    %33 = vector.load %arg7[%c0_20, %c0_21] : memref<1x32xf32, #tpu.memory_space<vmem>>, vector<1x32xf32>
    %34 = arith.mulf %27, %27 : vector<8x32xf32>
    %cst_22 = arith.constant dense<0.000000e+00> : vector<32xf32>
    %35 = vector.multi_reduction <add>, %34, %cst_22 [0] : vector<8x32xf32> to vector<32xf32>
    %36 = vector.shape_cast %35 : vector<32xf32> to vector<1x32xf32>
    %37 = arith.addf %33, %36 : vector<1x32xf32>
    %c0_23 = arith.constant 0 : index
    %c0_24 = arith.constant 0 : index
    %38 = vector.load %arg7[%c0_23, %c0_24] : memref<1x32xf32, #tpu.memory_space<vmem>>, vector<1x32xf32>
    tpu.vector_store %arg7[%c0_23, %c0_24], %37 {strides = array<i32>} : memref<1x32xf32, #tpu.memory_space<vmem>>, vector<1x32xf32>,
    return
  }
  func.func @transform_0(%arg0: i32) -> (i32, i32) {
    %c0_i32 = arith.constant 0 : i32
    %c0_i32_0 = arith.constant 0 : i32
    return %arg0, %c0_i32 : i32, i32
  }
  func.func @transform_1(%arg0: i32) -> (i32, i32) {
    %c0_i32 = arith.constant 0 : i32
    %c0_i32_0 = arith.constant 0 : i32
    %c0_i32_1 = arith.constant 0 : i32
    return %c0_i32, %c0_i32_0 : i32, i32
  }
  func.func @transform_2(%arg0: i32) -> (i32, i32) {
    %c0_i32 = arith.constant 0 : i32
    %c0_i32_0 = arith.constant 0 : i32
    %c0_i32_1 = arith.constant 0 : i32
    return %c0_i32, %c0_i32_0 : i32, i32
  }
  func.func @transform_3(%arg0: i32) -> (i32, i32) {
    %c0_i32 = arith.constant 0 : i32
    %c0_i32_0 = arith.constant 0 : i32
    %c0_i32_1 = arith.constant 0 : i32
    return %c0_i32, %c0_i32_0 : i32, i32
  }
  func.func @transform_4(%arg0: i32) -> (i32, i32) {
    %c0_i32 = arith.constant 0 : i32
    %c0_i32_0 = arith.constant 0 : i32
    %c0_i32_1 = arith.constant 0 : i32
    return %c0_i32, %c0_i32_0 : i32, i32
  }
  func.func @transform_5(%arg0: i32) -> (i32, i32) {
    %c0_i32 = arith.constant 0 : i32
    %c0_i32_0 = arith.constant 0 : i32
    %c0_i32_1 = arith.constant 0 : i32
    return %c0_i32, %c0_i32_0 : i32, i32
  }
  func.func @transform_6(%arg0: i32) -> (i32, i32) {
    %c0_i32 = arith.constant 0 : i32
    %c0_i32_0 = arith.constant 0 : i32
    %c0_i32_1 = arith.constant 0 : i32
    return %c0_i32, %c0_i32_0 : i32, i32
  }
}

module attributes {stable_mosaic.version = 11 : i64} {
  func.func @_fwd_kernel(%arg0: i32, %arg1: memref<8x16xf32, #tpu.memory_space<vmem>>, %arg2: memref<16x32xf32, #tpu.memory_space<vmem>>, %arg3: memref<1x32xf32, #tpu.memory_space<vmem>>, %arg4: memref<32x32xf32, #tpu.memory_space<vmem>>, %arg5: memref<1x32xf32, #tpu.memory_space<vmem>>, %arg6: memref<32x128xf32, #tpu.memory_space<vmem>>, %arg7: memref<1x128xf32, #tpu.memory_space<vmem>>, %arg8: memref<8x128xf32, #tpu.memory_space<vmem>>) attributes {dimension_semantics = [#tpu.dimension_semantics<parallel>], iteration_bounds = array<i64: 1>, scalar_prefetch = 0 : i64, scratch_operands = 0 : i64, tpu.core_type = #tpu.core_type<tc>, window_params = [{transform_indices = @transform_0, window_bounds = array<i64: 8, 16>}, {pipeline_mode = #tpu.pipeline_mode<synchronous>, transform_indices = @transform_1, window_bounds = array<i64: 16, 32>}, {pipeline_mode = #tpu.pipeline_mode<synchronous>, transform_indices = @transform_2, window_bounds = array<i64: 1, 32>}, {pipeline_mode = #tpu.pipeline_mode<synchronous>, transform_indices = @transform_3, window_bounds = array<i64: 32, 32>}, {pipeline_mode = #tpu.pipeline_mode<synchronous>, transform_indices = @transform_4, window_bounds = array<i64: 1, 32>}, {pipeline_mode = #tpu.pipeline_mode<synchronous>, transform_indices = @transform_5, window_bounds = array<i64: 32, 128>}, {pipeline_mode = #tpu.pipeline_mode<synchronous>, transform_indices = @transform_6, window_bounds = array<i64: 1, 128>}, {transform_indices = @transform_7, window_bounds = array<i64: 8, 128>}]} {
    %c0 = arith.constant 0 : index
    %c0_0 = arith.constant 0 : index
    %0 = vector.load %arg1[%c0, %c0_0] : memref<8x16xf32, #tpu.memory_space<vmem>>, vector<8x16xf32>
    %c0_1 = arith.constant 0 : index
    %c0_2 = arith.constant 0 : index
    %1 = vector.load %arg2[%c0_1, %c0_2] : memref<16x32xf32, #tpu.memory_space<vmem>>, vector<16x32xf32>
    %cst = arith.constant dense<0.000000e+00> : vector<8x32xf32>
    %2 = tpu.matmul %0, %1, %cst {dimension_numbers = #tpu.dot_dimension_numbers<[1], [0], [0], [1], [0, 0, 1, 1], [], []>} : vector<8x16xf32>, vector<16x32xf32>, vector<8x32xf32> -> vector<8x32xf32>
    %c0_3 = arith.constant 0 : index
    %c0_4 = arith.constant 0 : index
    %3 = vector.load %arg3[%c0_3, %c0_4] : memref<1x32xf32, #tpu.memory_space<vmem>>, vector<1x32xf32>
    %4 = vector.broadcast %3 : vector<1x32xf32> to vector<8x32xf32>
    %5 = arith.addf %2, %4 : vector<8x32xf32>
    %cst_5 = arith.constant 0.000000e+00 : f32
    %6 = vector.broadcast %cst_5 : f32 to vector<8x32xf32>
    %7 = arith.maximumf %5, %6 : vector<8x32xf32>
    %c0_6 = arith.constant 0 : index
    %c0_7 = arith.constant 0 : index
    %8 = vector.load %arg4[%c0_6, %c0_7] : memref<32x32xf32, #tpu.memory_space<vmem>>, vector<32x32xf32>
    %cst_8 = arith.constant dense<0.000000e+00> : vector<8x32xf32>
    %9 = tpu.matmul %7, %8, %cst_8 {dimension_numbers = #tpu.dot_dimension_numbers<[1], [0], [0], [1], [0, 0, 1, 1], [], []>} : vector<8x32xf32>, vector<32x32xf32>, vector<8x32xf32> -> vector<8x32xf32>
    %c0_9 = arith.constant 0 : index
    %c0_10 = arith.constant 0 : index
    %10 = vector.load %arg5[%c0_9, %c0_10] : memref<1x32xf32, #tpu.memory_space<vmem>>, vector<1x32xf32>
    %11 = vector.broadcast %10 : vector<1x32xf32> to vector<8x32xf32>
    %12 = arith.addf %9, %11 : vector<8x32xf32>
    %cst_11 = arith.constant 0.000000e+00 : f32
    %13 = vector.broadcast %cst_11 : f32 to vector<8x32xf32>
    %14 = arith.maximumf %12, %13 : vector<8x32xf32>
    %c0_12 = arith.constant 0 : index
    %c0_13 = arith.constant 0 : index
    %15 = vector.load %arg6[%c0_12, %c0_13] : memref<32x128xf32, #tpu.memory_space<vmem>>, vector<32x128xf32>
    %cst_14 = arith.constant dense<0.000000e+00> : vector<8x128xf32>
    %16 = tpu.matmul %14, %15, %cst_14 {dimension_numbers = #tpu.dot_dimension_numbers<[1], [0], [0], [1], [0, 0, 1, 1], [], []>} : vector<8x32xf32>, vector<32x128xf32>, vector<8x128xf32> -> vector<8x128xf32>
    %c0_15 = arith.constant 0 : index
    %c0_16 = arith.constant 0 : index
    %17 = vector.load %arg7[%c0_15, %c0_16] : memref<1x128xf32, #tpu.memory_space<vmem>>, vector<1x128xf32>
    %18 = vector.broadcast %17 : vector<1x128xf32> to vector<8x128xf32>
    %19 = arith.addf %16, %18 : vector<8x128xf32>
    %cst_17 = arith.constant 0.000000e+00 : f32
    %20 = vector.broadcast %cst_17 : f32 to vector<8x128xf32>
    %21 = arith.subf %20, %19 : vector<8x128xf32>
    %22 = math.exp %21 : vector<8x128xf32>
    %cst_18 = arith.constant 1.000000e+00 : f32
    %23 = vector.broadcast %cst_18 : f32 to vector<8x128xf32>
    %24 = arith.addf %23, %22 : vector<8x128xf32>
    %cst_19 = arith.constant 1.000000e+00 : f32
    %25 = vector.broadcast %cst_19 : f32 to vector<8x128xf32>
    %26 = arith.divf %25, %24 : vector<8x128xf32>
    %c0_20 = arith.constant 0 : index
    %c0_21 = arith.constant 0 : index
    %27 = vector.load %arg8[%c0_20, %c0_21] : memref<8x128xf32, #tpu.memory_space<vmem>>, vector<8x128xf32>
    tpu.vector_store %arg8[%c0_20, %c0_21], %26 {strides = array<i32>} : memref<8x128xf32, #tpu.memory_space<vmem>>, vector<8x128xf32>,
    return
  }
  func.func @transform_0(%arg0: i32) -> (i32, i32) {
    %c0_i32 = arith.constant 0 : i32
    %c0_i32_0 = arith.constant 0 : i32
    return %arg0, %c0_i32 : i32, i32
  }
  func.func @transform_1(%arg0: i32) -> (i32, i32) {
    %c0_i32 = arith.constant 0 : i32
    %c0_i32_0 = arith.constant 0 : i32
    %c0_i32_1 = arith.constant 0 : i32
    return %c0_i32, %c0_i32_0 : i32, i32
  }
  func.func @transform_2(%arg0: i32) -> (i32, i32) {
    %c0_i32 = arith.constant 0 : i32
    %c0_i32_0 = arith.constant 0 : i32
    %c0_i32_1 = arith.constant 0 : i32
    return %c0_i32, %c0_i32_0 : i32, i32
  }
  func.func @transform_3(%arg0: i32) -> (i32, i32) {
    %c0_i32 = arith.constant 0 : i32
    %c0_i32_0 = arith.constant 0 : i32
    %c0_i32_1 = arith.constant 0 : i32
    return %c0_i32, %c0_i32_0 : i32, i32
  }
  func.func @transform_4(%arg0: i32) -> (i32, i32) {
    %c0_i32 = arith.constant 0 : i32
    %c0_i32_0 = arith.constant 0 : i32
    %c0_i32_1 = arith.constant 0 : i32
    return %c0_i32, %c0_i32_0 : i32, i32
  }
  func.func @transform_5(%arg0: i32) -> (i32, i32) {
    %c0_i32 = arith.constant 0 : i32
    %c0_i32_0 = arith.constant 0 : i32
    %c0_i32_1 = arith.constant 0 : i32
    return %c0_i32, %c0_i32_0 : i32, i32
  }
  func.func @transform_6(%arg0: i32) -> (i32, i32) {
    %c0_i32 = arith.constant 0 : i32
    %c0_i32_0 = arith.constant 0 : i32
    %c0_i32_1 = arith.constant 0 : i32
    return %c0_i32, %c0_i32_0 : i32, i32
  }
  func.func @transform_7(%arg0: i32) -> (i32, i32) {
    %c0_i32 = arith.constant 0 : i32
    %c0_i32_0 = arith.constant 0 : i32
    return %arg0, %c0_i32 : i32, i32
  }
}

</mosaic_0001>

<bundles_post_ra>
// kernel: mydnn_forward.3
= control target key start
LH: loop header
LB: loop body
LE: loop exit
PB: predicated region body
PF: predicated region fallthrough
CT: control target
= control target key end

     0   :  { %10 = vsyncpa [#allocation3], 0  ;;  %s198_s15 = smov [#allocation2]   ;;  %s260_s0 = inlined_call_operand.hbm [shape: f32[8,16], index: 0, kind: input, shape index: {}]   ;;  %s261_s1 = inlined_call_operand.vmem [shape: f32[16,32], index: 1, kind: input, shape index: {}]   ;;  %s262_s2 = inlined_call_operand.vmem [shape: f32[1,32], index: 2, kind: input, shape index: {}]   ;;  %s263_s3 = inlined_call_operand.vmem [shape: f32[1,32], index: 3, kind: output, shape index: {0}]   ;;  %s264_s4 = inlined_call_operand.vmem [shape: f32[1,32], index: 4, kind: output, shape index: {1}]  }
   0x1   :  { %s17_s16 = sshll.u32 %s198_s15, 4  ;;  %s18_s16 = int_to_ptr.vmem [resolvable:$true] %s17_s16 }
   0x2   :  { %s184_s17 = scalar_lea.vmem %s18_s16, 128  ;;  %p189_p1 = scmp.lt.s32.totalorder %s18_s16, %s18_s16 }
   0x3   :  { %p185_p0 = scmp.ne.s32.totalorder %s18_s16, %s184_s17  ;;  %p190_p2 = scmp.lt.s32.totalorder %s184_s17, %s184_s17 }
   0x5   :  { %p191_p3 = por %p190_p2, %p189_p1 }
   0x7   :  { %p192_p4 = pnand %p191_p3, %p185_p0 }
   0x9   :  { %195 = shalt.err (!%p192_p4)
}
   0xa   :  { %20 = dma.hbm_to_vmem [thread:$0]  %s260_s0, 128, %s18_s16, [#allocation3]  }
   0xb   :  { %196 = dma.done.wait [#allocation3], 128  }
   0xc   :  { %197 = vsyncadd [#allocation3], 4294967168  ;;  %vm32_vm0 = vcmask 253952   ;;  %v199_v0 = vmov 0.0   ;;  %vm200_vm1 = vmmov 0   ;;  %v37_v1 = vld [vmem:[%s261_s1 + $0x8] sm:$0xff] }
   0xd   :  { %33 = vst.msk [vmem:[%s263_s3] sm:$0x1] %vm32_vm0, %v199_v0  ;;  %34 = vst.msk [vmem:[%s264_s4] sm:$0x1] %vm32_vm0, %v199_v0  ;;  %166 = vmatprep.subr.mxu0 %v199_v0  ;;  %170 = vmatprep.mubr.msk.f32.mxu0 %vm200_vm1, %v199_v0  ;;  %v36_v2 = vld [vmem:[%s261_s1] sm:$0xff]  ;;  %vm45_vm2 = vcmask 130048  }
   0xe   :  { %167 = vmatpush3.msra.mxu0 %v37_v1  ;;  %v35_v3 = vld [vmem:[#allocation2] sm:$0xff]  ;;  %vm130_vm3 = vcmask 261120  }
   0xf   :  { %168 = vmatprep.subr.mxu0 %v199_v0  ;;  %v161_v4 = vld [vmem:[%s262_s2] ss:$0 sm:$0xff] }
  0x10   :  { %169 = vmatpush3.msra.mxu0 %v36_v2 }
  0x11   :  { %171 = vmatmul.mubr.msk.f32.vlgmr.msra.gmra.mxu0 %vm45_vm2, %v35_v3 }
  0x14   :  { %v129_v21 = vld [vmem:[%s263_s3] sm:$0x1] }
  0x15   :  { %v141_v24 = vld [vmem:[%s264_s4] sm:$0x1] }
  0xd1   :  { %v115_v5 = vpop.f32.mrf.mxu0 }
  0xd2   :  { %v116_v6 = vadd.f32 %v161_v4, %v115_v5 }
  0xd3   :  { %v172_v7 = vpop.f32.mrf.mxu0 }
  0xd4   :  { %v119_v8 = vmax.f32 %v116_v6, 0.0 }
  0xd6   :  { %v131_v9 = vsel %vm130_vm3, %v119_v8, 0.0  ;;  %v142_v10 = vmul.f32 %v119_v8, %v119_v8 }
  0xd7   :  { %v132_v11 = vrot.slane %v131_v9, 4 }
  0xd8   :  { %v143_v12 = vsel %vm130_vm3, %v142_v10, 0.0 }
  0xd9   :  { %v133_v13 = vadd.f32 %v132_v11, %v131_v9  ;;  %v144_v14 = vrot.slane %v143_v12, 4 }
  0xdb   :  { %v134_v15 = vrot.slane %v133_v13, 2  ;;  %v145_v16 = vadd.f32 %v144_v14, %v143_v12 }
  0xdd   :  { %v135_v17 = vadd.f32 %v134_v15, %v133_v13  ;;  %v146_v18 = vrot.slane %v145_v16, 2 }
  0xdf   :  { %v136_v19 = vrot.slane %v135_v17, 1  ;;  %v147_v20 = vadd.f32 %v146_v18, %v145_v16 }
  0xe1   :  { %v137_v22 = vadd.f32 %v136_v19, %v135_v17  ;;  %v148_v23 = vrot.slane %v147_v20, 1 }
  0xe3   :  { %v138_v25 = vadd.f32 %v137_v22, %v129_v21  ;;  %v149_v26 = vadd.f32 %v148_v23, %v147_v20 }
  0xe5   :  { %140 = vst.msk [vmem:[%s263_s3] sm:$0x1] %vm32_vm0, %v138_v25  ;;  %v150_v27 = vadd.f32 %v149_v26, %v141_v24 }
  0xe7   :  { %151 = vst.msk [vmem:[%s264_s4] sm:$0x1] %vm32_vm0, %v150_v27 }
  0xe8   :  { %160 = vsyncpa [#allocation3], 1 }

// kernel: mydnn_forward.4
= control target key start
LH: loop header
LB: loop body
LE: loop exit
PB: predicated region body
PF: predicated region fallthrough
CT: control target
= control target key end

     0   :  { %v271_v0 = vmov 0.0   ;;  %vm272_vm0 = vmmov 0   ;;  %vm39_vm1 = vcmask 130048   ;;  %vm26_vm2 = vcmask 253952   ;;  %s357_s1 = inlined_call_operand.vmem [shape: f32[16,32], index: 1, kind: input, shape index: {}]   ;;  %s358_s0 = inlined_call_operand.vmem [shape: f32[8,16], index: 0, kind: input, shape index: {}]   ;;  %s359_s3 = inlined_call_operand.vmem [shape: f32[32,32], index: 3, kind: input, shape index: {}]   ;;  %s360_s5 = inlined_call_operand.vmem [shape: f32[1,32], index: 5, kind: output, shape index: {0}]   ;;  %s361_s6 = inlined_call_operand.vmem [shape: f32[1,32], index: 6, kind: output, shape index: {1}]   ;;  %s362_s2 = inlined_call_operand.vmem [shape: f32[1,32], index: 2, kind: input, shape index: {}]   ;;  %s363_s4 = inlined_call_operand.vmem [shape: f32[1,32], index: 4, kind: input, shape index: {}]  }
   0x1   :  { %251 = vmatprep.subr.mxu0 %v271_v0  ;;  %v31_v1 = vld [vmem:[%s357_s1 + $0x8] sm:$0xff]  ;;  %v30_v2 = vld [vmem:[%s357_s1] sm:$0xff]  ;;  %255 = vmatprep.mubr.msk.f32.mxu0 %vm272_vm0, %v271_v0  ;;  %v117_v4 = vld [vmem:[%s359_s3 + $0x18] sm:$0xff]  ;;  %27 = vst.msk [vmem:[%s360_s5] sm:$0x1] %vm26_vm2, %v271_v0  ;;  %vm125_vm3 = vcmask 261120  }
   0x2   :  { %252 = vmatpush3.msra.mxu0 %v31_v1  ;;  %v29_v3 = vld [vmem:[%s358_s0] sm:$0xff]  ;;  %258 = vmatprep.subr.mxu1 %v271_v0  ;;  %v116_v5 = vld [vmem:[%s359_s3 + $0x10] sm:$0xff]  ;;  %v115_v6 = vld [vmem:[%s359_s3 + $0x8] sm:$0xff]  ;;  %28 = vst.msk [vmem:[%s361_s6] sm:$0x1] %vm26_vm2, %v271_v0 }
   0x3   :  { %253 = vmatprep.subr.mxu0 %v271_v0  ;;  %259 = vmatpush3.msra.mxu1 %v117_v4  ;;  %v114_v7 = vld [vmem:[%s359_s3] sm:$0xff] }
   0x4   :  { %254 = vmatpush3.msra.mxu0 %v30_v2  ;;  %260 = vmatprep.subr.mxu1 %v271_v0  ;;  %v239_v8 = vld [vmem:[%s362_s2] ss:$0 sm:$0xff] }
   0x5   :  { %256 = vmatmul.mubr.msk.f32.vlgmr.msra.gmra.mxu0 %vm39_vm1, %v29_v3  ;;  %266 = vmatprep.mubr.msk.f32.mxu1 %vm272_vm0, %v271_v0  ;;  %v241_v13 = vld [vmem:[%s363_s4] ss:$0 sm:$0xff] }
   0x6   :  { %261 = vmatpush3.msra.mxu1 %v116_v5 }
   0x7   :  { %262 = vmatprep.subr.mxu1 %v271_v0 }
   0x8   :  { %263 = vmatpush3.msra.mxu1 %v115_v6  ;;  %v209_v30 = vld [vmem:[%s360_s5] sm:$0x1] }
   0x9   :  { %264 = vmatprep.subr.mxu1 %v271_v0  ;;  %v220_v33 = vld [vmem:[%s361_s6] sm:$0x1] }
   0xa   :  { %265 = vmatpush3.msra.mxu1 %v114_v7 }
  0xc5   :  { %v109_v9 = vpop.f32.mrf.mxu0 }
  0xc6   :  { %v110_v10 = vadd.f32 %v239_v8, %v109_v9 }
  0xc7   :  { %v257_v11 = vpop.f32.mrf.mxu0 }
  0xc8   :  { %v113_v12 = vmax.f32 %v110_v10, 0.0 }
  0xca   :  { %267 = vmatmul.mubr.msk.f32.vlgmr.msra.gmra.mxu1 %vm125_vm3, %v113_v12 }
 0x18a   :  { %v195_v14 = vpop.f32.mrf.mxu1 }
 0x18b   :  { %v196_v15 = vadd.f32 %v241_v13, %v195_v14 }
 0x18c   :  { %v268_v16 = vpop.f32.mrf.mxu1 }
 0x18d   :  { %v199_v17 = vmax.f32 %v196_v15, 0.0 }
 0x18f   :  { %v210_v18 = vsel %vm125_vm3, %v199_v17, 0.0  ;;  %v221_v19 = vmul.f32 %v199_v17, %v199_v17 }
 0x190   :  { %v211_v20 = vrot.slane %v210_v18, 4 }
 0x191   :  { %v222_v21 = vsel %vm125_vm3, %v221_v19, 0.0 }
 0x192   :  { %v212_v22 = vadd.f32 %v211_v20, %v210_v18  ;;  %v223_v23 = vrot.slane %v222_v21, 4 }
 0x194   :  { %v213_v24 = vrot.slane %v212_v22, 2  ;;  %v224_v25 = vadd.f32 %v223_v23, %v222_v21 }
 0x196   :  { %v214_v26 = vadd.f32 %v213_v24, %v212_v22  ;;  %v225_v27 = vrot.slane %v224_v25, 2 }
 0x198   :  { %v215_v28 = vrot.slane %v214_v26, 1  ;;  %v226_v29 = vadd.f32 %v225_v27, %v224_v25 }
 0x19a   :  { %v216_v31 = vadd.f32 %v215_v28, %v214_v26  ;;  %v227_v32 = vrot.slane %v226_v29, 1 }
 0x19c   :  { %v217_v34 = vadd.f32 %v216_v31, %v209_v30  ;;  %v228_v35 = vadd.f32 %v227_v32, %v226_v29 }
 0x19e   :  { %219 = vst.msk [vmem:[%s360_s5] sm:$0x1] %vm26_vm2, %v217_v34  ;;  %v229_v36 = vadd.f32 %v228_v35, %v220_v33 }
 0x1a0   :  { %230 = vst.msk [vmem:[%s361_s6] sm:$0x1] %vm26_vm2, %v229_v36 }

// kernel: mydnn_forward.5
= control target key start
LH: loop header
LB: loop body
LE: loop exit
PB: predicated region body
PF: predicated region fallthrough
CT: control target
= control target key end

     0   :  { %v346_v0 = vmov 0.0   ;;  %vm347_vm0 = vmmov 0   ;;  %vm36_vm1 = vcmask 130048   ;;  %vm122_vm2 = vcmask 261120   ;;  %s435_s1 = inlined_call_operand.vmem [shape: f32[16,32], index: 1, kind: input, shape index: {}]   ;;  %s436_s0 = inlined_call_operand.vmem [shape: f32[8,16], index: 0, kind: input, shape index: {}]   ;;  %s437_s3 = inlined_call_operand.vmem [shape: f32[32,32], index: 3, kind: input, shape index: {}]   ;;  %s438_s5 = inlined_call_operand.vmem [shape: f32[32,128], index: 5, kind: input, shape index: {}]   ;;  %s439_s2 = inlined_call_operand.vmem [shape: f32[1,32], index: 2, kind: input, shape index: {}]   ;;  %s440_s4 = inlined_call_operand.vmem [shape: f32[1,32], index: 4, kind: input, shape index: {}]   ;;  %s441_s6 = inlined_call_operand.vmem [shape: f32[1,128], index: 6, kind: input, shape index: {}]   ;;  %s442_s7 = inlined_call_operand.vmem [shape: f32[8,128], index: 7, kind: output, shape index: {}]  }
   0x1   :  { %311 = vmatprep.subr.mxu0 %v346_v0  ;;  %v28_v1 = vld [vmem:[%s435_s1 + $0x8] sm:$0xff]  ;;  %v27_v2 = vld [vmem:[%s435_s1] sm:$0xff]  ;;  %315 = vmatprep.mubr.msk.f32.mxu0 %vm347_vm0, %v346_v0  ;;  %v114_v4 = vld [vmem:[%s437_s3 + $0x18] sm:$0xff] }
   0x2   :  { %312 = vmatpush3.msra.mxu0 %v28_v1  ;;  %v26_v3 = vld [vmem:[%s436_s0] sm:$0xff]  ;;  %318 = vmatprep.subr.mxu1 %v346_v0  ;;  %v113_v5 = vld [vmem:[%s437_s3 + $0x10] sm:$0xff]  ;;  %v112_v6 = vld [vmem:[%s437_s3 + $0x8] sm:$0xff] }
   0x3   :  { %313 = vmatprep.subr.mxu0 %v346_v0  ;;  %319 = vmatpush3.msra.mxu1 %v114_v4  ;;  %v111_v7 = vld [vmem:[%s437_s3] sm:$0xff]  ;;  %v200_v8 = vld [vmem:[%s438_s5 + $0x18] sm:$0xff]  ;;  %v199_v14 = vld [vmem:[%s438_s5 + $0x10] sm:$0xff] }
   0x4   :  { %314 = vmatpush3.msra.mxu0 %v27_v2  ;;  %320 = vmatprep.subr.mxu1 %v346_v0  ;;  %v292_v9 = vld [vmem:[%s439_s2] ss:$0 sm:$0xff]  ;;  %v198_v15 = vld [vmem:[%s438_s5 + $0x8] sm:$0xff] }
   0x5   :  { %316 = vmatmul.mubr.msk.f32.vlgmr.msra.gmra.mxu0 %vm36_vm1, %v26_v3  ;;  %326 = vmatprep.mubr.msk.f32.mxu1 %vm347_vm0, %v346_v0  ;;  %v197_v16 = vld [vmem:[%s438_s5] sm:$0xff] }
   0x6   :  { %329 = vmatprep.subr.mxu0 %v346_v0  ;;  %337 = vmatprep.mubr.msk.f32.mxu0 %vm347_vm0, %v346_v0  ;;  %v294_v17 = vld [vmem:[%s440_s4] ss:$0 sm:$0xff] }
   0x7   :  { %321 = vmatpush3.msra.mxu1 %v113_v5  ;;  %330 = vmatpush3.msra.mxu0 %v200_v8  ;;  %v296_v22 = vld [vmem:[%s441_s6] ss:$0 sm:$0xff] }
   0x8   :  { %322 = vmatprep.subr.mxu1 %v346_v0  ;;  %331 = vmatprep.subr.mxu0 %v346_v0 }
   0x9   :  { %323 = vmatpush3.msra.mxu1 %v112_v6  ;;  %332 = vmatpush3.msra.mxu0 %v199_v14 }
   0xa   :  { %324 = vmatprep.subr.mxu1 %v346_v0  ;;  %333 = vmatprep.subr.mxu0 %v346_v0 }
   0xb   :  { %325 = vmatpush3.msra.mxu1 %v111_v7  ;;  %334 = vmatpush3.msra.mxu0 %v198_v15 }
   0xc   :  { %335 = vmatprep.subr.mxu0 %v346_v0 }
   0xd   :  { %336 = vmatpush3.msra.mxu0 %v197_v16 }
  0xc5   :  { %v106_v10 = vpop.f32.mrf.mxu0 }
  0xc6   :  { %v107_v11 = vadd.f32 %v292_v9, %v106_v10 }
  0xc7   :  { %v317_v12 = vpop.f32.mrf.mxu0 }
  0xc8   :  { %v110_v13 = vmax.f32 %v107_v11, 0.0 }
  0xca   :  { %327 = vmatmul.mubr.msk.f32.vlgmr.msra.gmra.mxu1 %vm122_vm2, %v110_v13 }
 0x18a   :  { %v192_v18 = vpop.f32.mrf.mxu1 }
 0x18b   :  { %v193_v19 = vadd.f32 %v294_v17, %v192_v18 }
 0x18c   :  { %v328_v20 = vpop.f32.mrf.mxu1 }
 0x18d   :  { %v196_v21 = vmax.f32 %v193_v19, 0.0 }
 0x18f   :  { %338 = vmatmul.mubr.msk.f32.vlgmr.msra.gmra.mxu0 %vm122_vm2, %v196_v21 }
 0x24f   :  { %v277_v23 = vpop.f32.mrf.mxu0 }
 0x250   :  { %v278_v24 = vadd.f32 %v296_v22, %v277_v23 }
 0x251   :  { %v339_v25 = vpop.f32.mrf.mxu0 }
 0x252   :  { %v281_v26 = vsub.f32 0.0, %v278_v24 }
 0x254   :  { %v282_v27 = vmul.f32 1.442695, %v281_v26 }
 0x256   :  { %342 = vpow2.f32 %v282_v27 }
 0x263   :  { %v343_v28 = vpop.eup %342 }
 0x264   :  { %v284_v29 = vadd.f32 1.0, %v343_v28 }
 0x266   :  { %344 = vrcp.f32 %v284_v29 }
 0x273   :  { %v345_v30 = vpop.eup %344 }
 0x274   :  { %287 = vst [vmem:[%s442_s7] sm:$0xff] %v345_v30 }

</bundles_post_ra>
